<compile_context>
chip_gen: v5e
topology: v5e:2x2
jax: 0.10.0
libtpu: 0.0.40
codegen_flags: <defaults>
</compile_context>

<pallas_src>
import math

import jax
import jax.numpy as jnp
from jax import lax
from jax.experimental import pallas as pl
from jax.experimental.pallas import tpu as pltpu


def _xi_template(s):
    # TODO(synk): the real xi_template is an external callable (e.g. a 2PCF
    # interpolator given at module construction); deterministic analytic stand-in.
    return jnp.exp(-0.1 * s) * jnp.cos(0.5 * s)


def custom_final_layer_kernel(x_ref, alpha_ref, wt_ref, rso_ref, out_ref):
    # rso_ref holds three stacked rows: r, scale, offset -> single DMA per N tile.
    r_row = rso_ref[0:1, :]         # [1, tn]
    scale_row = rso_ref[1:2, :]     # [1, tn]
    offset_row = rso_ref[2:3, :]    # [1, tn]

    # xi_template evaluated at alpha * r (alpha already has 0.05*x+1 folded in).
    s = alpha_ref[...] * r_row                       # [tm,1]*[1,tn] -> [tm,tn]
    xi = _xi_template(s)                             # EUP/VPU path, f32

    # Linear layer on the MXU: x [tm,K] . W^T [K,tn] -> [tm,tn].
    # W arrives pre-transposed, lane-dense in tn -> no per-tile RHS transpose.
    wx = lax.dot_general(x_ref[...], wt_ref[...],
                         dimension_numbers=(((1,), (0,)), ((), ())),
                         preferred_element_type=jnp.float32)

    # Folded rescale + bias: out = wx + xi*scale + offset.
    out_ref[...] = (wx + xi * scale_row + offset_row).astype(out_ref.dtype)


def _round_up(v, m):
    return (v + m - 1) // m * m


def _pick_n_tile(size_out_pad, pref=512):
    """Largest lane-dense (multiple-of-128) tile dividing size_out_pad, preferring a
    tile that yields >= 2 steps on the parallel N axis so both v7x TCs get work."""
    cands = [t for t in range(128, min(pref, size_out_pad) + 1, 128)
             if size_out_pad % t == 0]
    multi = [t for t in cands if size_out_pad // t >= 2]
    return max(multi) if multi else max(cands)


def custom_final_layer(x, alpha_prime, weights, bias, r,
                       width_params, width_degrees, mid_params, mid_degrees,
                       *, mxu_dtype=jnp.float32):
    """x: [B, size_in], alpha_prime: [B], weights: [size_out, size_in],
    bias: [size_out], r: [size_out]. Returns [B, size_out] float32."""
    B, size_in = x.shape
    size_out = weights.shape[0]

    # Static polynomial evaluation (mirrors reparametrize_xi_inside_NN), then fold
    # the affine rescale + bias into two row vectors (algebraically exact):
    #   out = x@W.T + bias + (xi - mid)/(1.25*width) + 0.5 = x@W.T + xi*scale + offset
    r = r.astype(jnp.float32)
    width_poly = jnp.zeros_like(r)
    for p, d in zip(width_params, width_degrees):
        width_poly = width_poly + p * r ** d
    mid_poly = jnp.zeros_like(r)
    for p, d in zip(mid_params, mid_degrees):
        mid_poly = mid_poly + p * r ** d
    scale = 1.0 / (1.25 * width_poly)                # assumes width_poly(r) != 0
    offset = bias.astype(jnp.float32) + 0.5 - mid_poly * scale

    # Lane-dense padding of the output (N) dim to a multiple of 128 (no vst.msk);
    # batch padded to a multiple of 8 for the (8,128) block rule. Sliced at the end.
    size_out_pad = _round_up(size_out, 128)
    n_pad = size_out_pad - size_out
    B_pad = _round_up(B, 8)
    m_pad = B_pad - B

    # MXU operands (optionally bf16: halves W HBM traffic, full rate on v6e/v7x MXU).
    x_in = jnp.pad(x.astype(mxu_dtype), ((0, m_pad), (0, 0)))                 # [Bp, K]
    w_t = jnp.pad(weights.T.astype(mxu_dtype), ((0, 0), (0, n_pad)))          # [K, Np]
    alpha_col = jnp.pad((0.05 * alpha_prime + 1.0).astype(jnp.float32)
                        .reshape(B, 1), ((0, m_pad), (0, 0)))                 # [Bp, 1]
    rso = jnp.pad(jnp.stack([r, scale, offset], axis=0), ((0, 0), (0, n_pad)))  # [3, Np]

    # Tiling: M capped, N lane-dense, K (size_in) whole per tile.
    tm = min(B_pad, 256)
    tn = _pick_n_tile(size_out_pad)
    grid_m = pl.cdiv(B_pad, tm)
    grid_n = size_out_pad // tn
    # Grid order (N outer, M inner): W's block index is constant across the inner M
    # sweep, so each W tile is DMA'd from HBM exactly once; x (much smaller) is
    # re-streamed per N tile instead.
    grid = (grid_n, grid_m)

    # Explicit scoped-VMEM budget from the chosen tiles (2x double buffering),
    # valid on v5e (16 MiB default) / v6e / v7x (64 MiB physical) alike.
    mxu_bytes = jnp.dtype(mxu_dtype).itemsize
    per_step = (tm * size_in * mxu_bytes            # x tile
                + size_in * tn * mxu_bytes          # W tile
                + 8 * 128 * 4                       # alpha sliver (padded layout)
                + 8 * tn * 4                        # stacked r/scale/offset sliver
                + tm * tn * 4)                      # output tile
    vmem_limit = int(min(max(2.5 * per_step + (2 << 20), 32 << 20), 64 << 20))

    flops = 2 * B_pad * size_in * size_out_pad
    transcendentals = 2 * B_pad * size_out_pad       # exp + cos per element
    bytes_accessed = int(grid_n * x_in.size * mxu_bytes + w_t.size * mxu_bytes
                         + 4 * (B_pad * size_out_pad + rso.size + B_pad))

    out = pl.pallas_call(
        custom_final_layer_kernel,
        out_shape=jax.ShapeDtypeStruct((B_pad, size_out_pad), jnp.float32),
        grid=grid,
        in_specs=[
            pl.BlockSpec((tm, size_in), lambda j, i: (i, 0)),     # x
            pl.BlockSpec((tm, 1), lambda j, i: (i, 0)),           # alpha (folded)
            # W^T tile: resident across the inner (M) axis.
            # (Optionally pipeline_mode=pl.Buffered(3) if a trace shows it exposed.)
            pl.BlockSpec((size_in, tn), lambda j, i: (0, j)),
            pl.BlockSpec((3, tn), lambda j, i: (0, j)),           # [r; scale; offset]
        ],
        out_specs=pl.BlockSpec((tm, tn), lambda j, i: (i, j)),
        compiler_params=pltpu.CompilerParams(
            dimension_semantics=("parallel", "parallel"),
            vmem_limit_bytes=vmem_limit),
        cost_estimate=pl.CostEstimate(flops=flops,
                                      transcendentals=transcendentals,
                                      bytes_accessed=bytes_accessed),
    )(x_in, alpha_col, w_t, rso)

    return out[:B, :size_out]


def _reference(x, alpha_prime, weights, bias, r,
               width_params, width_degrees, mid_params, mid_degrees):
    width_poly = sum(p * r ** d for p, d in zip(width_params, width_degrees))
    mid_poly = sum(p * r ** d for p, d in zip(mid_params, mid_degrees))
    alpha = 0.05 * alpha_prime + 1.0
    xi = _xi_template(alpha[:, None] * r[None, :])
    rescaled = (xi - mid_poly[None, :]) / (1.25 * width_poly[None, :]) + 0.5
    return x @ weights.T + bias[None, :] + rescaled


if __name__ == "__main__":
    B, size_in, size_out = 8, 32, 256

    key = jax.random.PRNGKey(0)
    kx, ka, kw, kb = jax.random.split(key, 4)

    x = jax.random.normal(kx, (B, size_in), dtype=jnp.float32)
    alpha_prime = jax.random.normal(ka, (B,), dtype=jnp.float32)

    # kaiming_uniform_(a=sqrt(5)) on [size_out, size_in] -> bound = 1/sqrt(fan_in)
    bound = 1.0 / math.sqrt(size_in)
    weights = jax.random.uniform(kw, (size_out, size_in), jnp.float32,
                                 minval=-bound, maxval=bound)
    bias = jax.random.uniform(kb, (size_out,), jnp.float32,
                              minval=-bound, maxval=bound)

    # Radial bins r (module buffer) and synthetic scaling-polynomial coefficients
    # (stand-in for xi_scaling_polynomial.txt; not read from disk).
    r = jnp.linspace(0.5, 50.0, size_out, dtype=jnp.float32)
    width_params, width_degrees = (0.8, 0.01), (0, 1)   # width_poly(r) > 0
    mid_params, mid_degrees = (0.1, 0.002), (0, 1)

    ref = _reference(x, alpha_prime, weights, bias, r,
                     width_params, width_degrees, mid_params, mid_degrees)

    # f32 MXU path: exact to tight tolerance.
    out = custom_final_layer(x, alpha_prime, weights, bias, r,
                             width_params, width_degrees,
                             mid_params, mid_degrees)
    out = jax.block_until_ready(out)
    assert out.shape == (B, size_out)
    assert jnp.allclose(out, ref, atol=1e-4, rtol=1e-4)

    # bf16 MXU path (preferred on v6e/v7x for the memory roofline): looser tolerance.
    out_bf16 = custom_final_layer(x, alpha_prime, weights, bias, r,
                                  width_params, width_degrees,
                                  mid_params, mid_degrees,
                                  mxu_dtype=jnp.bfloat16)
    out_bf16 = jax.block_until_ready(out_bf16)
    assert jnp.allclose(out_bf16, ref, atol=5e-2, rtol=5e-2)

    print("KERNEL_OK")
</pallas_src>

<mosaic_0001>
module attributes {stable_mosaic.version = 11 : i64} {
  func.func @custom_final_layer_kernel(%arg0: i32, %arg1: i32, %arg2: memref<8x32xf32, #tpu.memory_space<vmem>>, %arg3: memref<8x1xf32, #tpu.memory_space<vmem>>, %arg4: memref<32x128xf32, #tpu.memory_space<vmem>>, %arg5: memref<3x128xf32, #tpu.memory_space<vmem>>, %arg6: memref<8x128xf32, #tpu.memory_space<vmem>>) attributes {dimension_semantics = [#tpu.dimension_semantics<parallel>, #tpu.dimension_semantics<parallel>], iteration_bounds = array<i64: 2, 1>, scalar_prefetch = 0 : i64, scratch_operands = 0 : i64, tpu.core_type = #tpu.core_type<tc>, window_params = [{transform_indices = @transform_0, window_bounds = array<i64: 8, 32>}, {transform_indices = @transform_1, window_bounds = array<i64: 8, 1>}, {transform_indices = @transform_2, window_bounds = array<i64: 32, 128>}, {transform_indices = @transform_3, window_bounds = array<i64: 3, 128>}, {transform_indices = @transform_4, window_bounds = array<i64: 8, 128>}]} {
    %c0 = arith.constant 0 : index
    %c0_0 = arith.constant 0 : index
    %0 = vector.load %arg5[%c0, %c0_0] : memref<3x128xf32, #tpu.memory_space<vmem>>, vector<1x128xf32>
    %c1 = arith.constant 1 : index
    %c0_1 = arith.constant 0 : index
    %1 = vector.load %arg5[%c1, %c0_1] : memref<3x128xf32, #tpu.memory_space<vmem>>, vector<1x128xf32>
    %c2 = arith.constant 2 : index
    %c0_2 = arith.constant 0 : index
    %2 = vector.load %arg5[%c2, %c0_2] : memref<3x128xf32, #tpu.memory_space<vmem>>, vector<1x128xf32>
    %c0_3 = arith.constant 0 : index
    %c0_4 = arith.constant 0 : index
    %3 = vector.load %arg3[%c0_3, %c0_4] : memref<8x1xf32, #tpu.memory_space<vmem>>, vector<8x1xf32>
    %4 = vector.broadcast %3 : vector<8x1xf32> to vector<8x128xf32>
    %5 = vector.broadcast %0 : vector<1x128xf32> to vector<8x128xf32>
    %6 = arith.mulf %4, %5 : vector<8x128xf32>
    %cst = arith.constant -1.000000e-01 : f32
    %7 = vector.broadcast %cst : f32 to vector<8x128xf32>
    %8 = arith.mulf %7, %6 : vector<8x128xf32>
    %9 = math.exp %8 : vector<8x128xf32>
    %cst_5 = arith.constant 5.000000e-01 : f32
    %10 = vector.broadcast %cst_5 : f32 to vector<8x128xf32>
    %11 = arith.mulf %10, %6 : vector<8x128xf32>
    %12 = math.cos %11 : vector<8x128xf32>
    %13 = arith.mulf %9, %12 : vector<8x128xf32>
    %c0_6 = arith.constant 0 : index
    %c0_7 = arith.constant 0 : index
    %14 = vector.load %arg2[%c0_6, %c0_7] : memref<8x32xf32, #tpu.memory_space<vmem>>, vector<8x32xf32>
    %c0_8 = arith.constant 0 : index
    %c0_9 = arith.constant 0 : index
    %15 = vector.load %arg4[%c0_8, %c0_9] : memref<32x128xf32, #tpu.memory_space<vmem>>, vector<32x128xf32>
    %cst_10 = arith.constant dense<0.000000e+00> : vector<8x128xf32>
    %16 = tpu.matmul %14, %15, %cst_10 {dimension_numbers = #tpu.dot_dimension_numbers<[1], [0], [0], [1], [0, 0, 1, 1], [], []>} : vector<8x32xf32>, vector<32x128xf32>, vector<8x128xf32> -> vector<8x128xf32>
    %17 = vector.broadcast %1 : vector<1x128xf32> to vector<8x128xf32>
    %18 = arith.mulf %13, %17 : vector<8x128xf32>
    %19 = arith.addf %16, %18 : vector<8x128xf32>
    %20 = vector.broadcast %2 : vector<1x128xf32> to vector<8x128xf32>
    %21 = arith.addf %19, %20 : vector<8x128xf32>
    %c0_11 = arith.constant 0 : index
    %c0_12 = arith.constant 0 : index
    %22 = vector.load %arg6[%c0_11, %c0_12] : memref<8x128xf32, #tpu.memory_space<vmem>>, vector<8x128xf32>
    tpu.vector_store %arg6[%c0_11, %c0_12], %21 {strides = array<i32>} : memref<8x128xf32, #tpu.memory_space<vmem>>, vector<8x128xf32>,
    return
  }
  func.func @transform_0(%arg0: i32, %arg1: i32) -> (i32, i32) {
    %c0_i32 = arith.constant 0 : i32
    %c0_i32_0 = arith.constant 0 : i32
    return %arg1, %c0_i32 : i32, i32
  }
  func.func @transform_1(%arg0: i32, %arg1: i32) -> (i32, i32) {
    %c0_i32 = arith.constant 0 : i32
    %c0_i32_0 = arith.constant 0 : i32
    return %arg1, %c0_i32 : i32, i32
  }
  func.func @transform_2(%arg0: i32, %arg1: i32) -> (i32, i32) {
    %c0_i32 = arith.constant 0 : i32
    %c0_i32_0 = arith.constant 0 : i32
    return %c0_i32, %arg0 : i32, i32
  }
  func.func @transform_3(%arg0: i32, %arg1: i32) -> (i32, i32) {
    %c0_i32 = arith.constant 0 : i32
    %c0_i32_0 = arith.constant 0 : i32
    return %c0_i32, %arg0 : i32, i32
  }
  func.func @transform_4(%arg0: i32, %arg1: i32) -> (i32, i32) {
    %c0_i32 = arith.constant 0 : i32
    return %arg1, %arg0 : i32, i32
  }
}

</mosaic_0001>

<bundles_post_ra>
// kernel: tpu_custom_call.1
= control target key start
LH: loop header
LB: loop body
LE: loop exit
PB: predicated region body
PF: predicated region fallthrough
CT: control target
= control target key end

     0   :  { %s1176_s0 = inlined_call_operand.vmem [shape: f32[8,32], index: 0, kind: input, shape index: {}]   ;;  %s1177_s1 = inlined_call_operand.vmem [shape: f32[8,1], index: 1, kind: input, shape index: {}]   ;;  %s1178_s2 = inlined_call_operand.hbm [shape: f32[32,256], index: 2, kind: input, shape index: {}]   ;;  %s1179_s3 = inlined_call_operand.hbm [shape: f32[3,256], index: 3, kind: input, shape index: {}]   ;;  %s1180_s4 = inlined_call_operand.hbm [shape: f32[8,256], index: 4, kind: output, shape index: {}]  }
   0x1   :  { %1182 = sst [smem:[#allocation12_spill]] %s1178_s2 }
   0x2   :  { %9 = vsyncpa [#allocation3], 0 }
   0x3   :  { %11 = vsyncpa [#allocation3 + $0x1], 0 }
   0x4   :  { %12 = vsyncpa [#allocation6], 0 }
   0x5   :  { %14 = vsyncpa [#allocation6 + $0x1], 0 }
   0x6   :  { %15 = vsyncpa [#allocation4], 0 }
   0x7   :  { %17 = vsyncpa [#allocation4 + $0x1], 0  ;;  %s947_s15 = smov 0   ;;  %s949_s16 = smov 0  }
   0x8   :  { %s951_s17 = smov 0   ;;  %s953_s18 = smov 0  }
   0x9   :  { %s955_s19 = smov 0   ;;  %s957_s20 = smov 0  }
   0xa LB: > { %s659_s21 = sadd.s32 4294967295, %s910_s20   ;;  %s660_s22 = sadd.s32 4294967294, %s910_s20   ;;  %s910_s20 = sphi %s957_s20, %s23_s20   ;;  %s906_s19 = sphi %s955_s19, %s1197_s19   ;;  %s902_s18 = sphi %s953_s18, %s1196_s18   ;;  %s898_s17 = sphi %s951_s17, %s1195_s17   ;;  %s894_s16 = sphi %s949_s16, %s1194_s16   ;;  %s890_s15 = sphi %s947_s15, %s1193_s15  }
   0xb   : > { %s35_s23 = sadd.s32 1, %s906_s19  ;;  %s94_s24 = sadd.s32 1, %s898_s17 }
   0xc   : > { %p37_p0 = scmp.ge.s32.totalorder %s35_s23, 2  ;;  %p101_p1 = scmp.ne.s32.totalorder %s898_s17, %s894_s16 }
   0xd   : > { %p102_p2 = scmp.eq.s32.totalorder %s910_s20, 0  ;;  %p107_p3 = scmp.ne.s32.totalorder %s894_s16, %s890_s15 }
   0xe   : > { %s1199_s23 = smov (%p37_p0, %s35_s23), 0  ;;  %p108_p5 = scmp.eq.s32.totalorder %s659_s21, 0 }
   0xf   : > { %1183 = sst [smem:[#allocation11_spill]] %s1199_s23  ;;  %p988_p4 = por %p102_p2, %p101_p1 }
  0x10   : > { %s91_s26 = ssub.s32 %s906_s19, %s1199_s23  ;;  %p159_p6 = scmp.eq.s32.totalorder %s659_s21, 1 }
  0x11   : > { %p92_p7 = scmp.eq.s32.totalorder %s91_s26, 0  ;;  %p994_p8 = por %p108_p5, %p107_p3 }
  0x12   : > { %p998_p9 = por %p159_p6, %p101_p1  ;;  %p165_p10 = scmp.eq.s32.totalorder %s660_s22, 1 }
  0x13   : > { %s1003_s29 = scalar_select %p92_p7, %s898_s17, %s94_s24  }
  0x14   : > { %p1005_p11 = por %p165_p10, %p107_p3  ;;  %p664_p12 = scmp.ge.s32.totalorder %s910_s20, 2 }
  0x15   : > { %p698_p13 = scmp.lt.s32.totalorder %s910_s20, 2  ;;  %s1012_s5 = sand.u32 1, %s898_s17  }
  0x16   : > { %s665_s6 = sshll.u32 %s1012_s5, 5  ;;  %s666_s7 = sshll.u32 %s906_s19, 3 }
  0x17   : > { %s1188_s2 = sld [smem:[#allocation12_spill]]  ;;  %s203_s11 = scalar_lea.vmem [#allocation2], %s665_s6 }
  0x18   : > { %s210_s12 = sshll.u32 %s203_s11, 4  ;;  %p1021_p0 = pnand %p698_p13, %p988_p4  ;;  %s211_s12 = int_to_ptr.vmem [resolvable:$true] %s210_s12 }
  0x19   : > { %s200_s21 = scalar_lea.sflag [#allocation3], %s1012_s5  ;;  %s912_s22 = smov 256  }
  0x1a   : > { %s913_s24 = smov 128   ;;  %s914_s26 = smov 8  }
  0x1b   : > { %p669_p1 = scmp.ge.s32.totalorder %s910_s20, 1  ;;  %p237_p2 = scmp.lt.s32.totalorder %s910_s20, 3 }
  0x1c   : > { %s667_s6 = sshll.u32 %s1012_s5, 2  ;;  %s221_s23 = scalar_lea.sflag [#allocation6], %s1012_s5 }
  0x1d   : > { %s207_s10 = scalar_lea.hbm %s1188_s2, %s666_s7  ;;  %p238_p3 = pnand %p669_p1, %p237_p2 }
  0x1e   : > { %s208_s13 = sshll.u32 %s207_s10, 4  ;;  %s668_s7 = sshll.u32 %s906_s19, 2  ;;  %s209_s13 = int_to_ptr.hbm [resolvable:$true] %s208_s13 }
  0x1f   : > { %690 = dma.hbm_to_vmem [thread:$0]  (!%p1021_p0), %s209_s13, 512, %s211_s12, %s200_s21, %s912_s22, %s913_s24, %s914_s26  }
  0x20   : > { %s224_s8 = scalar_lea.vmem [#allocation5], %s667_s6  ;;  %s228_s11 = scalar_lea.hbm %s1179_s3, %s668_s7 }
  0x21   : > { %s232_s25 = sshll.u32 %s224_s8, 4  ;;  %s230_s2 = sshll.u32 %s228_s11, 4  ;;  %s233_s25 = int_to_ptr.vmem [resolvable:$true] %s232_s25  ;;  %s231_s2 = int_to_ptr.hbm [resolvable:$true] %s230_s2 }
  0x22   : > { %693 = dma.hbm_to_vmem [thread:$0]  (!%p1021_p0), %s231_s2, 64, %s233_s25, %s221_s23  }
  0x23   : > { %241 = sbr.rel (%p238_p3) target bundleno = 272 (0x110), region = 36  ;;  %s1039_s12 = sand.u32 (!%p238_p3), 1, %s894_s16  }
  0x24   : > { %s670_s13 = sshll.u32 (!%p238_p3), %s1039_s12, 5  ;;  %s244_s21 = scalar_lea.sflag (!%p238_p3), [#allocation3], %s1039_s12 }
  0x25   : > { %s247_s22 = scalar_lea.vmem (!%p238_p3), [#allocation2], %s670_s13 }
  0x28   : > { %877 = dma.done.wait (%p994_p8), %s244_s21, 512  }
  0x29   : > { %879 = vsyncadd (%p994_p8), %s244_s21, 4294966784  ;;  %s671_s5 = sshll.u32 %s1039_s12, 2  ;;  %s254_s2 = scalar_lea.sflag [#allocation6], %s1039_s12 }
  0x2a   : > { %s1049_s23 = scalar_lea.vmem [#allocation5], %s671_s5 }
  0x2b   : > { %881 = dma.done.wait (%p994_p8), %s254_s2, 64  }
  0x2c   : > { %883 = vsyncadd (%p994_p8), %s254_s2, 4294967232  ;;  %v915_v0 = vmov 0   ;;  %v307_v1 = vld [vmem:[%s1177_s1] sm:$0xff]  ;;  %v478_v2 = vld [vmem:[%s247_s22 + $0x18] sm:$0xff]  ;;  %vm481_vm0 = vcmask 261120   ;;  %s672_s27 = sshll.u32 %s1039_s12, 3 }
  0x2d   : > { %758 = vset.pattern.permute.xlu0 %v915_v0  ;;  %v477_v3 = vld [vmem:[%s247_s22 + $0x10] sm:$0xff]  ;;  %497 = vmatpush.msra.mxu0 %v478_v2  ;;  %v476_v4 = vld [vmem:[%s247_s22 + $0x8] sm:$0xff]  ;;  %v475_v5 = vld [vmem:[%s247_s22] sm:$0xff]  ;;  %v916_v22 = vmov 683565275   ;;  %s678_s7 = sshll.u32 %s902_s18, 3 }
  0x2e   : > { %310 = vperm.xlu0 %758, %v307_v1   ;;  %v474_v6 = vld [vmem:[%s1176_s0] sm:$0xff]  ;;  %v917_v24 = vmov 2475754826   ;;  %v918_v27 = vmov 2131351028   ;;  %s521_s9 = scalar_lea.hbm %s1180_s4, %s678_s7  ;;  %s295_s10 = scalar_lea.vmem [#allocation7], %s672_s27 }
  0x2f   : > { %498 = vmatpush.msra.mxu0 %v477_v3  ;;  %v759_v7 = vld [vmem:[%s1049_s23] ss:$0 sm:$0xff]  ;;  %v919_v30 = vmov 2102212464   ;;  %v920_v33 = vmov 920167782  }
  0x30   : > { %v921_v36 = vmov 1326507024   ;;  %s523_s11 = sshll.u32 %s295_s10, 4  ;;  %s525_s13 = sshll.u32 %s521_s9, 4  ;;  %s524_s11 = int_to_ptr.vmem [resolvable:$true] %s523_s11  ;;  %s526_s13 = int_to_ptr.hbm [resolvable:$true] %s525_s13 }
  0x31   : > { %499 = vmatpush.msra.mxu0 %v476_v4  ;;  %s509_s18 = scalar_lea.sflag [#allocation4], %s1039_s12  ;;  %s838_s21 = sshra.s32 %s526_s13, 4  ;;  %s839_s21 = int_to_ptr.hbm [resolvable:$true] %s838_s21 }
  0x32   : > { %s840_s22 = scalar_lea.hbm %s839_s21, 8  ;;  %p845_p7 = scmp.lt.s32.totalorder %s839_s21, %s1180_s4 }
  0x33   : > { %500 = vmatpush.msra.mxu0 %v475_v5  ;;  %p841_p4 = scmp.ne.s32.totalorder %s839_s21, %s840_s22 }
  0x34   : > { %676 = vmatmul.msk.f32.vlgmr.msra.gmra.mxu0 %vm481_vm0, %v474_v6 }
  0x35   : > { %p842_p5 = pnand %p841_p4, %p998_p9 }
  0x37   : > { %p843_p6 = pneg %p842_p5 }
  0xa0   : > { %v311_v8 = vpop.permute.xlu0 %310 }
  0xa1   : > { %v1063_v9 = vmul.f32 %v759_v7, %v311_v8 }
  0xa3   : > { %v1066_v10 = vmul.f32 0.5, %v1063_v9 }
  0xa5   : > { %v322_v11 = vand.u32 2139095040, %v1066_v10  ;;  %v319_v14 = vand.u32 2147483647, %v1066_v10  ;;  %vm321_vm13 = vcmp.lt.s32.totalorder %v1066_v10, 0 }
  0xa7   : > { %v323_v12 = vshrl.u32 %v322_v11, 23  ;;  %v326_v16 = vand.u32 8388607, %v319_v14  ;;  %vm1124_vm14 = vcmp.le.f32.partialorder %v319_v14, 0.7853982 }
  0xa9   : > { %v673_v13 = vadd.s32 4294967169, %v323_v12  ;;  %v327_v20 = vor.u32 8388608, %v326_v16 }
  0xab   : > { %v329_v15 = vadd.s32 1, %v673_v13  ;;  %v1083_v43 = vshll.u32 %v327_v20, 8 }
  0xad   : > { %vm330_vm1 = vcmp.gt.s32.totalorder %v329_v15, 0  ;;  %v368_v52 = vand.u32 65535, %v1083_v43  ;;  %v369_v53 = vshrl.u32 %v1083_v43, 16 }
  0xae   : > { %v331_v17 = vsel %vm330_vm1, %v329_v15, 0 }
  0xaf   : > { %v333_v18 = vand.u32 31, %v331_v17  ;;  %v1074_v21 = vshrl.u32 %v331_v17, 5 }
  0xb1   : > { %v1072_v19 = vsub.s32 32, %v333_v18  ;;  %v336_v23 = vshll.u32 %v916_v22, %v333_v18  ;;  %v339_v25 = vshll.u32 %v917_v24, %v333_v18  ;;  %v342_v29 = vshll.u32 %v918_v27, %v333_v18 }
  0xb2   : > { %v345_v32 = vshll.u32 %v919_v30, %v333_v18  ;;  %v348_v35 = vshll.u32 %v920_v33, %v333_v18  ;;  %vm351_vm2 = vcmp.lt.s32.totalorder %v1074_v21, 1  ;;  %vm354_vm3 = vcmp.lt.s32.totalorder %v1074_v21, 4 }
  0xb3   : > { %v337_v26 = vshrl.u32 %v917_v24, %v1072_v19  ;;  %v340_v28 = vshrl.u32 %v918_v27, %v1072_v19  ;;  %v343_v31 = vshrl.u32 %v919_v30, %v1072_v19  ;;  %v346_v34 = vshrl.u32 %v920_v33, %v1072_v19 }
  0xb4   : > { %v349_v37 = vshrl.u32 %v921_v36, %v1072_v19  ;;  %vm353_vm4 = vcmp.lt.s32.totalorder %v1074_v21, 3  ;;  %vm352_vm5 = vcmp.lt.s32.totalorder %v1074_v21, 2  ;;  %v335_v18 = vshrl.u32 %v916_v22, %v1072_v19 }
  0xb5   : > { %v338_v38 = vor.u32 %v337_v26, %v336_v23  ;;  %v341_v39 = vor.u32 %v340_v28, %v339_v25  ;;  %v344_v40 = vor.u32 %v343_v31, %v342_v29  ;;  %v347_v41 = vor.u32 %v346_v34, %v345_v32 }
  0xb6   : > { %v350_v42 = vor.u32 %v349_v37, %v348_v35 }
  0xb7   : > { %v359_v44 = vsel %vm351_vm2, %v338_v38, %v341_v39  ;;  %v363_v45 = vsel %vm351_vm2, %v341_v39, %v344_v40  ;;  %v360_v46 = vsel %vm354_vm3, %v347_v41, 920167782  ;;  %v356_v15 = vsel %vm354_vm3, %v344_v40, 2102212464 }
  0xb8   : > { %v364_v47 = vsel %vm354_vm3, %v350_v42, 1326507024  ;;  %v361_v48 = vsel %vm353_vm4, %v344_v40, %v360_v46  ;;  %v355_v27 = vsel %vm351_vm2, %v335_v18, %v338_v38  ;;  %v357_v28 = vsel %vm353_vm4, %v341_v39, %v356_v15 }
  0xb9   : > { %v365_v49 = vsel %vm353_vm4, %v347_v41, %v364_v47  ;;  %v362_v50 = vsel %vm352_vm5, %v359_v44, %v361_v48  ;;  %v358_v19 = vsel %vm352_vm5, %v355_v27, %v357_v28  ;;  %vm462_vm2 = vweird.f32 %v1066_v10  ;;  %v760_v28 = vld [vmem:[%s1049_s23 + $0x1] ss:$0 sm:$0xff] }
  0xba   : > { %v366_v51 = vsel %vm352_vm5, %v363_v45, %v365_v49  ;;  %v392_v56 = vand.u32 65535, %v362_v50  ;;  %v393_v57 = vshrl.u32 %v362_v50, 16  ;;  %v412_v35 = vmul.u32 %v1083_v43, %v358_v19 }
  0xbb   : > { %v370_v54 = vand.u32 65535, %v366_v51  ;;  %v371_v55 = vshrl.u32 %v366_v51, 16 }
  0xbc   : > { %v395_v60 = vmul.u32 %v393_v57, %v368_v52  ;;  %v396_v61 = vmul.u32 %v392_v56, %v369_v53  ;;  %v394_v2 = vmul.u32 %v392_v56, %v368_v52  ;;  %v397_v6 = vmul.u32 %v393_v57, %v369_v53 }
  0xbd   : > { %v373_v58 = vmul.u32 %v371_v55, %v368_v52  ;;  %v374_v59 = vmul.u32 %v370_v54, %v369_v53  ;;  %v372_v62 = vmul.u32 %v370_v54, %v368_v52  ;;  %v375_v1 = vmul.u32 %v371_v55, %v369_v53 }
  0xbe   : > { %v398_v3 = vshll.u32 %v395_v60, 16  ;;  %v400_v8 = vshll.u32 %v396_v61, 16  ;;  %v399_v25 = vshrl.u32 %v395_v60, 16  ;;  %v401_v31 = vshrl.u32 %v396_v61, 16 }
  0xbf   : > { %v376_v63 = vshll.u32 %v373_v58, 16  ;;  %v378_v4 = vshll.u32 %v374_v59, 16  ;;  %v377_v20 = vshrl.u32 %v373_v58, 16  ;;  %v379_v29 = vshrl.u32 %v374_v59, 16 }
  0xc0   : > { %vm402_vm7 = vc.u32 %v394_v2, %v398_v3  ;;  %v404_v11 = vadd.s32 %v398_v3, %v394_v2 }
  0xc1   : > { %vm380_vm6 = vc.u32 %v372_v62, %v376_v63  ;;  %v382_v5 = vadd.s32 %v376_v63, %v372_v62  ;;  %v403_v13 = vsel %vm402_vm7, 1, %v915_v0 }
  0xc2   : > { %v381_v7 = vsel %vm380_vm6, 1, %v915_v0  ;;  %v405_v17 = vadd.s32 %v403_v13, %v397_v6  ;;  %vm406_vm9 = vc.u32 %v404_v11, %v400_v8  ;;  %v408_v34 = vadd.s32 %v404_v11, %v400_v8 }
  0xc3   : > { %v383_v12 = vadd.s32 %v381_v7, %v375_v1  ;;  %vm384_vm8 = vc.u32 %v382_v5, %v378_v4  ;;  %v407_v24 = vsel %vm406_vm9, 1, %v915_v0  ;;  %v315_v5 = vmul.f32 -0.1, %v1063_v9 }
  0xc4   : > { %v385_v16 = vsel %vm384_vm8, 1, %v915_v0  ;;  %v409_v26 = vadd.s32 %v407_v24, %v405_v17 }
  0xc5   : > { %v387_v23 = vadd.s32 %v385_v16, %v383_v12  ;;  %v316_v12 = vmul.f32 1.442695, %v315_v5 }
  0xc6   : > { %v410_v32 = vadd.s32 %v409_v26, %v399_v25 }
  0xc7   : > { %v388_v30 = vadd.s32 %v387_v23, %v377_v20  ;;  %762 = vpow2.f32 %v316_v12 }
  0xc8   : > { %v411_v22 = vadd.s32 %v410_v32, %v401_v31  ;;  %v502_v32 = vpop.f32.mrf.mxu0 }
  0xc9   : > { %v389_v33 = vadd.s32 %v388_v30, %v379_v29 }
  0xca   : > { %v415_v0 = vadd.s32 1, %v411_v22 }
  0xcb   : > { %vm414_vm10 = vc.u32 %v389_v33, %v408_v34  ;;  %v413_v21 = vadd.s32 %v408_v34, %v389_v33  ;;  %v761_v34 = vld [vmem:[%s1049_s23 + $0x2] ss:$0 sm:$0xff]  ;;  %s844_s23 = scalar_lea.hbm %s1180_s4, 16 }
  0xcc   : > { %v416_v36 = vsel %vm414_vm10, %v415_v0, %v411_v22  ;;  %p846_p8 = scmp.lt.s32.totalorder %s844_s23, %s840_s22 }
  0xcd   : > { %v417_v37 = vadd.s32 %v416_v36, %v412_v35  ;;  %v763_v29 = vpop.eup %762 }
  0xce   : > { %p847_p10 = por %p846_p8, %p845_p7 }
  0xcf   : > { %v418_v38 = vadd.s32 536870912, %v417_v37 }
  0xd0   : > { %p848_p13 = pnand %p847_p10, %p843_p6 }
  0xd1   : > { %v419_v40 = vshrl.u32 %v418_v38, 30 }
  0xd3   : > { %v420_v41 = vshll.u32 %v419_v40, 30  ;;  %v443_v2 = vsub.s32 4, %v419_v40 }
  0xd5   : > { %v421_v39 = vsub.s32 %v417_v37, %v420_v41  ;;  %v444_v8 = vsel %vm321_vm13, %v443_v2, %v419_v40 }
  0xd6   : > { %v446_v13 = vsel %vm1124_vm14, 0, %v444_v8 }
  0xd7   : > { %vm422_vm11 = vcmp.lt.s32.totalorder %v421_v39, 0  ;;  %v423_v42 = vsub.s32 0, %v421_v39  ;;  %v463_v20 = vand.u32 3, %v446_v13 }
  0xd9   : > { %v424_v44 = vsel %vm422_vm11, %v423_v42, %v421_v39  ;;  %vm465_vm15 = vcmp.eq.s32.totalorder %v463_v20, 0  ;;  %vm468_vm0 = vcmp.eq.s32.totalorder %v463_v20, 2  ;;  %vm464_vm1 = vcmp.lt.s32.totalorder %v463_v20, 2 }
  0xda   : > { %v425_v45 = vclz %v424_v44 }
  0xdc   : > { %v674_v46 = vadd.s32 4294967294, %v425_v45 }
  0xde   : > { %vm675_vm12 = vcmp.lt.s32.totalorder %v674_v46, 0 }
  0xdf   : > { %v428_v47 = vsel %vm675_vm12, 0, %v674_v46 }
  0xe0   : > { %v429_v48 = vsub.s32 32, %v428_v47  ;;  %v433_v49 = vsub.s32 4294967266, %v428_v47  ;;  %v430_v50 = vshll.u32 %v421_v39, %v428_v47 }
  0xe2   : > { %v431_v51 = vshrl.u32 %v413_v21, %v429_v48  ;;  %v434_v52 = vadd.s32 127, %v433_v49 }
  0xe4   : > { %v432_v43 = vor.u32 %v431_v51, %v430_v50  ;;  %v435_v53 = vshll.u32 %v434_v52, 23 }
  0xe6   : > { %v436_v54 = vor.u32 4788187, %v435_v53  ;;  %v439_v56 = vcvt.s32.f32 %v432_v43 }
  0xe8   : > { %v437_v55 = vand.u32 2147483647, %v436_v54 }
  0xea   : > { %v440_v57 = vmul.f32 %v439_v56, %v437_v55 }
  0xec   : > { %v441_v58 = vxor.u32 2147483648, %v440_v57 }
  0xee   : > { %v442_v60 = vsel %vm321_vm13, %v441_v58, %v440_v57 }
  0xef   : > { %v445_v61 = vsel %vm1124_vm14, %v1066_v10, %v442_v60 }
  0xf0   : > { %v447_v62 = vmul.f32 %v445_v61, %v445_v61 }
  0xf2   : > { %v448_v63 = vmul.f32 -0.001358992, %v447_v62  ;;  %v455_v1 = vmul.f32 -0.00019511016, %v447_v62 }
  0xf4   : > { %v449_v3 = vadd.f32 0.041655596, %v448_v63  ;;  %v456_v4 = vadd.f32 0.008332121, %v455_v1 }
  0xf6   : > { %v450_v6 = vmul.f32 %v449_v3, %v447_v62  ;;  %v457_v7 = vmul.f32 %v456_v4, %v447_v62 }
  0xf8   : > { %v451_v14 = vadd.f32 -0.4999988, %v450_v6  ;;  %v458_v11 = vadd.f32 -0.16666654, %v457_v7 }
  0xfa   : > { %v452_v15 = vmul.f32 %v451_v14, %v447_v62  ;;  %v459_v16 = vmul.f32 %v458_v11, %v447_v62 }
  0xfc   : > { %v453_v17 = vadd.f32 1.0, %v452_v15  ;;  %v460_v18 = vadd.f32 1.0, %v459_v16 }
  0xfe   : > { %v461_v23 = vmul.f32 %v460_v18, %v445_v61  ;;  %v469_v9 = vxor.u32 2147483648, %v453_v17 }
 0x100   : > { %v466_v24 = vxor.u32 2147483648, %v461_v23  ;;  %v470_v26 = vsel %vm468_vm0, %v469_v9, %v461_v23 }
 0x102   : > { %v467_v25 = vsel %vm465_vm15, %v453_v17, %v466_v24 }
 0x103   : > { %v471_v27 = vsel %vm464_vm1, %v467_v25, %v470_v26 }
 0x104   : > { %v472_v30 = vsel %vm462_vm2, nan, %v471_v27 }
 0x105   : > { %v473_v31 = vmul.f32 %v763_v29, %v472_v30 }
 0x107   : > { %v480_v33 = vmul.f32 %v760_v28, %v473_v31 }
 0x109   : > { %v503_v19 = vadd.f32 %v502_v32, %v480_v33 }
 0x10b   : > { %v506_v22 = vadd.f32 %v761_v34, %v503_v19 }
 0x10d   : > { %507 = vst [vmem:[%s295_s10] sm:$0xff] %v506_v22 }
 0x10e   : > { %851 = shalt.err (!%p848_p13)
}
 0x10f   : > { %685 = dma.vmem_to_hbm [thread:$0]  (%p998_p9), %s524_s11, 128, %s526_s13, %s509_s18  }
 0x110 PF: > { %s537_s12 = sand.u32 1, %s890_s15   ;;  %p695_p0 = pnand %p664_p12, %p1005_p11 }
 0x111   : > { %s538_s26 = scalar_lea.sflag [#allocation4], %s537_s12 }
 0x112   : > { %p696_p1 = pneg %p695_p0 }
 0x114   : > { %885 = dma.done.wait (%p696_p1), %s538_s26, 128  }
 0x115   : > { %887 = vsyncadd (%p696_p1), %s538_s26, 4294967168  ;;  %s23_s20 = sadd.s32 1, %s910_s20   ;;  %s1192_s28 = sld [smem:[#allocation11_spill]] }
 0x116   : > { %p20_p2 = scmp.ge.s32.totalorder %s23_s20, 4   ;;  %s1193_s15 = smov %s894_s16 }
 0x117   : > { %s1194_s16 = smov %s898_s17  ;;  %s1195_s17 = smov %s1003_s29 }
 0x118   : > { %s1196_s18 = smov %s906_s19  ;;  %22 = sbr.rel (!%p20_p2) target bundleno = 10 (0xa), region = 100 }
 0x11b   : > { %s1197_s19 = smov %s1192_s28 }
 0x11d   :  { %544 = vsyncpa [#allocation3], 1 }
 0x11e   :  { %546 = vsyncpa [#allocation3 + $0x1], 1 }
 0x11f   :  { %547 = vsyncpa [#allocation6], 1 }
 0x120   :  { %549 = vsyncpa [#allocation6 + $0x1], 1 }
 0x121   :  { %550 = vsyncpa [#allocation4], 1 }
 0x122   :  { %552 = vsyncpa [#allocation4 + $0x1], 1 }

</bundles_post_ra>
